<compile_context>
chip_gen: v5e
topology: v5e:2x2
jax: 0.10.0
libtpu: 0.0.40
codegen_flags: <defaults>
</compile_context>

<pallas_src>
import functools

import jax
import jax.numpy as jnp
from jax.experimental import pallas as pl
from jax.experimental.pallas import tpu as pltpu

LANE = 128      # vreg lane width
SUBLANE = 8     # vreg sublane count (f32)


def _round_up(n, m):
    return (n + m - 1) // m * m


def mlp_kernel(x_ref, w1_ref, b1_ref, w2_ref, b2_ref, o_ref):
    # layer1: (TILE_B, IN_P) @ (IN_P, HID_P) + b1
    x = x_ref[...]
    h = jnp.dot(x, w1_ref[...], preferred_element_type=jnp.float32) + b1_ref[...]
    # sigmoid (exact: exp on EUP, exact divide)
    h = 1.0 / (1.0 + jnp.exp(-h))
    # layer2: (TILE_B, HID_P) @ (HID_P, OUT_P) + b2
    logits = jnp.dot(h, w2_ref[...], preferred_element_type=jnp.float32) + b2_ref[...]
    # Numerically stable softmax over last axis. Padded output columns carry a
    # -1e30 bias, so exp(logit - m) == 0 there and they do not pollute the sum.
    m = jnp.max(logits, axis=-1, keepdims=True)
    e = jnp.exp(logits - m)
    denom = jnp.sum(e, axis=-1, keepdims=True)
    o_ref[...] = (e / denom).astype(o_ref.dtype)


def prepare_params(w1, b1, w2, b2):
    """One-time parameter prep (NOT per forward call): transpose PyTorch
    (out, in) weights to (in, out) matmul layout and zero-pad every feature
    dim to a multiple of 128 lanes. Padded output-class bias slots are set to
    -1e30 so their softmax contribution is exactly zero."""
    hidden, in_dim = w1.shape
    out_dim, _ = w2.shape
    in_p = _round_up(in_dim, LANE)
    hid_p = _round_up(hidden, LANE)
    out_p = _round_up(out_dim, LANE)

    w1_t = jnp.zeros((in_p, hid_p), jnp.float32).at[:in_dim, :hidden].set(w1.T)
    b1_p = jnp.zeros((1, hid_p), jnp.float32).at[:, :hidden].set(b1)
    w2_t = jnp.zeros((hid_p, out_p), jnp.float32).at[:hidden, :out_dim].set(w2.T)
    b2_p = jnp.full((1, out_p), -1e30, jnp.float32).at[:, :out_dim].set(b2)
    return w1_t, b1_p, w2_t, b2_p, (in_dim, out_dim)


@functools.partial(jax.jit, static_argnames=("in_dim", "out_dim"))
def linear_model_forward(x, w1_t, b1_p, w2_t, b2_p, *, in_dim, out_dim):
    """x: (B, in_dim) f32. Weights must come from prepare_params()."""
    batch = x.shape[0]
    in_p, hid_p = w1_t.shape
    out_p = w2_t.shape[1]

    # Batch tile: sublane-aligned, capped at 128 rows per grid step so the
    # per-step tiles stay small (fits comfortably inside v7x's 64 MiB VMEM
    # with double-buffering and the resident weight blocks).
    tile_b = min(128, _round_up(batch, SUBLANE))
    batch_p = _round_up(batch, tile_b)

    # Zero-pad activations into the lane/sublane-aligned slab (padded feature
    # columns hit zero W1 rows; padded batch rows are sliced off below).
    x_p = jnp.zeros((batch_p, in_p), jnp.float32).at[:batch, :in_dim].set(x)

    grid = (batch_p // tile_b,)
    y_p = pl.pallas_call(
        mlp_kernel,
        out_shape=jax.ShapeDtypeStruct((batch_p, out_p), jnp.float32),
        grid=grid,
        in_specs=[
            pl.BlockSpec((tile_b, in_p), lambda i: (i, 0)),   # streamed activations
            pl.BlockSpec((in_p, hid_p), lambda i: (0, 0)),    # resident W1
            pl.BlockSpec((1, hid_p), lambda i: (0, 0)),       # resident b1
            pl.BlockSpec((hid_p, out_p), lambda i: (0, 0)),   # resident W2
            pl.BlockSpec((1, out_p), lambda i: (0, 0)),       # resident b2
        ],
        out_specs=pl.BlockSpec((tile_b, out_p), lambda i: (i, 0)),
        compiler_params=pltpu.CompilerParams(
            dimension_semantics=("parallel",),  # batch grid is embarrassingly parallel
        ),
    )(x_p, w1_t, b1_p, w2_t, b2_p)

    # Drop batch / output-class padding (padded classes hold exact zeros).
    return y_p[:batch, :out_dim]


def init_linear_params(key, fan_in, fan_out):
    # Mimic PyTorch nn.Linear default init: U(-1/sqrt(fan_in), 1/sqrt(fan_in))
    kw, kb = jax.random.split(key)
    bound = 1.0 / jnp.sqrt(jnp.float32(fan_in))
    w = jax.random.uniform(kw, (fan_out, fan_in), jnp.float32, -bound, bound)
    b = jax.random.uniform(kb, (fan_out,), jnp.float32, -bound, bound)
    return w, b


if __name__ == "__main__":
    # NOTE: toy sizes — at these shapes the kernel is launch/DMA-overhead
    # dominated; the tiling/padding structure is what scales to real sizes.
    batch, input_size, hidden_size, output_size = 8, 32, 64, 16

    key = jax.random.PRNGKey(0)
    kx, k1, k2 = jax.random.split(key, 3)

    x = jax.random.normal(kx, (batch, input_size), jnp.float32)
    w1, b1 = init_linear_params(k1, input_size, hidden_size)
    w2, b2 = init_linear_params(k2, hidden_size, output_size)

    # One-time weight prep (transpose + lane padding), then forward.
    w1_t, b1_p, w2_t, b2_p, (in_dim, out_dim) = prepare_params(w1, b1, w2, b2)
    y = linear_model_forward(x, w1_t, b1_p, w2_t, b2_p,
                             in_dim=in_dim, out_dim=out_dim)
    y = jax.block_until_ready(y)

    # Pure-JAX reference of the PyTorch forward.
    h_ref = jax.nn.sigmoid(x @ w1.T + b1)
    y_ref = jax.nn.softmax(h_ref @ w2.T + b2, axis=-1)

    assert y.shape == (batch, output_size)
    assert jnp.allclose(jnp.sum(y, axis=-1), 1.0, atol=1e-3)
    assert jnp.allclose(y, y_ref, atol=1e-3, rtol=1e-3)

    print("KERNEL_OK")
</pallas_src>

<mosaic_0001>
module attributes {stable_mosaic.version = 11 : i64} {
  func.func @mlp_kernel(%arg0: i32, %arg1: memref<8x128xf32, #tpu.memory_space<vmem>>, %arg2: memref<128x128xf32, #tpu.memory_space<vmem>>, %arg3: memref<1x128xf32, #tpu.memory_space<vmem>>, %arg4: memref<128x128xf32, #tpu.memory_space<vmem>>, %arg5: memref<1x128xf32, #tpu.memory_space<vmem>>, %arg6: memref<8x128xf32, #tpu.memory_space<vmem>>) attributes {dimension_semantics = [#tpu.dimension_semantics<parallel>], iteration_bounds = array<i64: 1>, scalar_prefetch = 0 : i64, scratch_operands = 0 : i64, tpu.core_type = #tpu.core_type<tc>, window_params = [{transform_indices = @transform_0, window_bounds = array<i64: 8, 128>}, {pipeline_mode = #tpu.pipeline_mode<synchronous>, transform_indices = @transform_1, window_bounds = array<i64: 128, 128>}, {pipeline_mode = #tpu.pipeline_mode<synchronous>, transform_indices = @transform_2, window_bounds = array<i64: 1, 128>}, {pipeline_mode = #tpu.pipeline_mode<synchronous>, transform_indices = @transform_3, window_bounds = array<i64: 128, 128>}, {pipeline_mode = #tpu.pipeline_mode<synchronous>, transform_indices = @transform_4, window_bounds = array<i64: 1, 128>}, {transform_indices = @transform_5, window_bounds = array<i64: 8, 128>}]} {
    %c0 = arith.constant 0 : index
    %c0_0 = arith.constant 0 : index
    %0 = vector.load %arg1[%c0, %c0_0] : memref<8x128xf32, #tpu.memory_space<vmem>>, vector<8x128xf32>
    %c0_1 = arith.constant 0 : index
    %c0_2 = arith.constant 0 : index
    %1 = vector.load %arg2[%c0_1, %c0_2] : memref<128x128xf32, #tpu.memory_space<vmem>>, vector<128x128xf32>
    %cst = arith.constant dense<0.000000e+00> : vector<8x128xf32>
    %2 = tpu.matmul %0, %1, %cst {dimension_numbers = #tpu.dot_dimension_numbers<[1], [0], [0], [1], [0, 0, 1, 1], [], []>} : vector<8x128xf32>, vector<128x128xf32>, vector<8x128xf32> -> vector<8x128xf32>
    %c0_3 = arith.constant 0 : index
    %c0_4 = arith.constant 0 : index
    %3 = vector.load %arg3[%c0_3, %c0_4] : memref<1x128xf32, #tpu.memory_space<vmem>>, vector<1x128xf32>
    %4 = vector.broadcast %3 : vector<1x128xf32> to vector<8x128xf32>
    %5 = arith.addf %2, %4 : vector<8x128xf32>
    %cst_5 = arith.constant 0.000000e+00 : f32
    %6 = vector.broadcast %cst_5 : f32 to vector<8x128xf32>
    %7 = arith.subf %6, %5 : vector<8x128xf32>
    %8 = math.exp %7 : vector<8x128xf32>
    %cst_6 = arith.constant 1.000000e+00 : f32
    %9 = vector.broadcast %cst_6 : f32 to vector<8x128xf32>
    %10 = arith.addf %9, %8 : vector<8x128xf32>
    %cst_7 = arith.constant 1.000000e+00 : f32
    %11 = vector.broadcast %cst_7 : f32 to vector<8x128xf32>
    %12 = arith.divf %11, %10 : vector<8x128xf32>
    %c0_8 = arith.constant 0 : index
    %c0_9 = arith.constant 0 : index
    %13 = vector.load %arg4[%c0_8, %c0_9] : memref<128x128xf32, #tpu.memory_space<vmem>>, vector<128x128xf32>
    %cst_10 = arith.constant dense<0.000000e+00> : vector<8x128xf32>
    %14 = tpu.matmul %12, %13, %cst_10 {dimension_numbers = #tpu.dot_dimension_numbers<[1], [0], [0], [1], [0, 0, 1, 1], [], []>} : vector<8x128xf32>, vector<128x128xf32>, vector<8x128xf32> -> vector<8x128xf32>
    %c0_11 = arith.constant 0 : index
    %c0_12 = arith.constant 0 : index
    %15 = vector.load %arg5[%c0_11, %c0_12] : memref<1x128xf32, #tpu.memory_space<vmem>>, vector<1x128xf32>
    %16 = vector.broadcast %15 : vector<1x128xf32> to vector<8x128xf32>
    %17 = arith.addf %14, %16 : vector<8x128xf32>
    %cst_13 = arith.constant dense<0xFF800000> : vector<8xf32>
    %18 = vector.multi_reduction <maximumf>, %17, %cst_13 [1] : vector<8x128xf32> to vector<8xf32>
    %19 = vector.shape_cast %18 : vector<8xf32> to vector<8x1xf32>
    %20 = vector.broadcast %19 : vector<8x1xf32> to vector<8x128xf32>
    %21 = arith.subf %17, %20 : vector<8x128xf32>
    %22 = math.exp %21 : vector<8x128xf32>
    %cst_14 = arith.constant dense<0.000000e+00> : vector<8xf32>
    %23 = vector.multi_reduction <add>, %22, %cst_14 [1] : vector<8x128xf32> to vector<8xf32>
    %24 = vector.shape_cast %23 : vector<8xf32> to vector<8x1xf32>
    %25 = vector.broadcast %24 : vector<8x1xf32> to vector<8x128xf32>
    %26 = arith.divf %22, %25 : vector<8x128xf32>
    %c0_15 = arith.constant 0 : index
    %c0_16 = arith.constant 0 : index
    %27 = vector.load %arg6[%c0_15, %c0_16] : memref<8x128xf32, #tpu.memory_space<vmem>>, vector<8x128xf32>
    tpu.vector_store %arg6[%c0_15, %c0_16], %26 {strides = array<i32>} : memref<8x128xf32, #tpu.memory_space<vmem>>, vector<8x128xf32>,
    return
  }
  func.func @transform_0(%arg0: i32) -> (i32, i32) {
    %c0_i32 = arith.constant 0 : i32
    %c0_i32_0 = arith.constant 0 : i32
    return %arg0, %c0_i32 : i32, i32
  }
  func.func @transform_1(%arg0: i32) -> (i32, i32) {
    %c0_i32 = arith.constant 0 : i32
    %c0_i32_0 = arith.constant 0 : i32
    %c0_i32_1 = arith.constant 0 : i32
    return %c0_i32, %c0_i32_0 : i32, i32
  }
  func.func @transform_2(%arg0: i32) -> (i32, i32) {
    %c0_i32 = arith.constant 0 : i32
    %c0_i32_0 = arith.constant 0 : i32
    %c0_i32_1 = arith.constant 0 : i32
    return %c0_i32, %c0_i32_0 : i32, i32
  }
  func.func @transform_3(%arg0: i32) -> (i32, i32) {
    %c0_i32 = arith.constant 0 : i32
    %c0_i32_0 = arith.constant 0 : i32
    %c0_i32_1 = arith.constant 0 : i32
    return %c0_i32, %c0_i32_0 : i32, i32
  }
  func.func @transform_4(%arg0: i32) -> (i32, i32) {
    %c0_i32 = arith.constant 0 : i32
    %c0_i32_0 = arith.constant 0 : i32
    %c0_i32_1 = arith.constant 0 : i32
    return %c0_i32, %c0_i32_0 : i32, i32
  }
  func.func @transform_5(%arg0: i32) -> (i32, i32) {
    %c0_i32 = arith.constant 0 : i32
    %c0_i32_0 = arith.constant 0 : i32
    return %arg0, %c0_i32 : i32, i32
  }
}

</mosaic_0001>

<bundles_post_ra>
// kernel: linear_model_forward.1
= control target key start
LH: loop header
LB: loop body
LE: loop exit
PB: predicated region body
PF: predicated region fallthrough
CT: control target
= control target key end

     0   :  { %10 = vsyncpa [#allocation3], 0  ;;  %s340_s0 = inlined_call_operand.vmem [shape: f32[8,128], index: 0, kind: input, shape index: {}]   ;;  %s341_s1 = inlined_call_operand.hbm [shape: f32[128,128], index: 1, kind: input, shape index: {}]   ;;  %s342_s2 = inlined_call_operand.vmem [shape: f32[1,128], index: 2, kind: input, shape index: {}]   ;;  %s343_s3 = inlined_call_operand.hbm [shape: f32[128,128], index: 3, kind: input, shape index: {}]   ;;  %s344_s4 = inlined_call_operand.vmem [shape: f32[1,128], index: 4, kind: input, shape index: {}]   ;;  %s345_s5 = inlined_call_operand.hbm [shape: f32[8,128], index: 5, kind: output, shape index: {}]  }
   0x1   :  { %11 = vsyncpa [#allocation6], 0 }
   0x2   :  { %12 = vsyncpa [#allocation4], 0  ;;  %s19_s20 = sshll.u32 %s341_s1, 4  ;;  %s287_s21 = smov [#allocation2]   ;;  %s20_s20 = int_to_ptr.hbm [resolvable:$true] %s19_s20 }
   0x3   :  { %s21_s22 = sshll.u32 %s287_s21, 4  ;;  %s34_s25 = sshll.u32 %s343_s3, 4  ;;  %s22_s22 = int_to_ptr.vmem [resolvable:$true] %s21_s22  ;;  %s35_s25 = int_to_ptr.hbm [resolvable:$true] %s34_s25 }
   0x4   :  { %s288_s26 = smov 128   ;;  %s289_s27 = smov 8  }
   0x5   :  { %27 = dma.hbm_to_vmem [thread:$0]  %s20_s20, 2048, %s22_s22, [#allocation3], %s288_s26, %s288_s26, %s289_s27  }
   0x6   :  { %s290_s28 = smov [#allocation5]  }
   0x7   :  { %s36_s29 = sshll.u32 %s290_s28, 4  ;;  %s37_s29 = int_to_ptr.vmem [resolvable:$true] %s36_s29 }
   0x8   :  { %42 = dma.hbm_to_vmem [thread:$0]  %s35_s25, 2048, %s37_s29, [#allocation6], %s288_s26, %s288_s26, %s289_s27  }
   0x9   :  { %281 = dma.done.wait [#allocation3], 2048  }
   0xa   :  { %282 = vsyncadd [#allocation3], 4294965248 }
   0xb   :  { %283 = dma.done.wait [#allocation6], 2048  }
   0xc   :  { %284 = vsyncadd [#allocation6], 4294965248  ;;  %v69_v0 = vld [vmem:[#allocation2 + $0x78] sm:$0xff]  ;;  %v68_v1 = vld [vmem:[#allocation2 + $0x70] sm:$0xff]  ;;  %s183_s10 = sshll.u32 %s345_s5, 4  ;;  %s184_s10 = int_to_ptr.hbm [resolvable:$true] %s183_s10 }
   0xd   :  { %74 = vmatpush.msra.mxu0 %v69_v0  ;;  %v67_v2 = vld [vmem:[#allocation2 + $0x68] sm:$0xff]  ;;  %v66_v3 = vld [vmem:[#allocation2 + $0x60] sm:$0xff]  ;;  %v65_v4 = vld [vmem:[#allocation2 + $0x58] sm:$0xff] }
   0xe   :  { %v64_v5 = vld [vmem:[#allocation2 + $0x50] sm:$0xff]  ;;  %v63_v6 = vld [vmem:[#allocation2 + $0x48] sm:$0xff]  ;;  %v62_v7 = vld [vmem:[#allocation2 + $0x40] sm:$0xff] }
   0xf   :  { %75 = vmatpush.msra.mxu0 %v68_v1  ;;  %v61_v8 = vld [vmem:[#allocation2 + $0x38] sm:$0xff]  ;;  %v60_v9 = vld [vmem:[#allocation2 + $0x30] sm:$0xff]  ;;  %v59_v10 = vld [vmem:[#allocation2 + $0x28] sm:$0xff] }
  0x10   :  { %v58_v11 = vld [vmem:[#allocation2 + $0x20] sm:$0xff]  ;;  %v57_v12 = vld [vmem:[#allocation2 + $0x18] sm:$0xff]  ;;  %v56_v13 = vld [vmem:[#allocation2 + $0x10] sm:$0xff] }
  0x11   :  { %76 = vmatpush.msra.mxu0 %v67_v2  ;;  %v55_v14 = vld [vmem:[#allocation2 + $0x8] sm:$0xff]  ;;  %v54_v15 = vld [vmem:[#allocation2] sm:$0xff]  ;;  %v128_v17 = vld [vmem:[#allocation5 + $0x78] sm:$0xff] }
  0x12   :  { %v53_v16 = vld [vmem:[%s340_s0] sm:$0xff]  ;;  %133 = vmatpush.msra.mxu1 %v128_v17  ;;  %v127_v18 = vld [vmem:[#allocation5 + $0x70] sm:$0xff]  ;;  %v126_v19 = vld [vmem:[#allocation5 + $0x68] sm:$0xff] }
  0x13   :  { %77 = vmatpush.msra.mxu0 %v66_v3  ;;  %v125_v20 = vld [vmem:[#allocation5 + $0x60] sm:$0xff]  ;;  %v124_v21 = vld [vmem:[#allocation5 + $0x58] sm:$0xff]  ;;  %v123_v22 = vld [vmem:[#allocation5 + $0x50] sm:$0xff] }
  0x14   :  { %134 = vmatpush.msra.mxu1 %v127_v18  ;;  %v122_v23 = vld [vmem:[#allocation5 + $0x48] sm:$0xff]  ;;  %v121_v24 = vld [vmem:[#allocation5 + $0x40] sm:$0xff]  ;;  %v120_v25 = vld [vmem:[#allocation5 + $0x38] sm:$0xff] }
  0x15   :  { %78 = vmatpush.msra.mxu0 %v65_v4  ;;  %v119_v26 = vld [vmem:[#allocation5 + $0x30] sm:$0xff]  ;;  %v118_v27 = vld [vmem:[#allocation5 + $0x28] sm:$0xff]  ;;  %v117_v28 = vld [vmem:[#allocation5 + $0x20] sm:$0xff] }
  0x16   :  { %135 = vmatpush.msra.mxu1 %v126_v19  ;;  %v116_v29 = vld [vmem:[#allocation5 + $0x18] sm:$0xff]  ;;  %v115_v30 = vld [vmem:[#allocation5 + $0x10] sm:$0xff]  ;;  %v114_v31 = vld [vmem:[#allocation5 + $0x8] sm:$0xff] }
  0x17   :  { %79 = vmatpush.msra.mxu0 %v64_v5  ;;  %v199_v32 = vld [vmem:[%s342_s2] ss:$0 sm:$0xff] }
  0x18   :  { %136 = vmatpush.msra.mxu1 %v125_v20  ;;  %v113_v33 = vld [vmem:[#allocation5] sm:$0xff] }
  0x19   :  { %80 = vmatpush.msra.mxu0 %v63_v6  ;;  %v200_v50 = vld [vmem:[%s344_s4] ss:$0 sm:$0xff]  ;;  %s291_s4 = smov [#allocation7]  }
  0x1a   :  { %137 = vmatpush.msra.mxu1 %v124_v21  ;;  %s181_s7 = sshll.u32 %s291_s4, 4  ;;  %s182_s7 = int_to_ptr.vmem [resolvable:$true] %s181_s7 }
  0x1b   :  { %81 = vmatpush.msra.mxu0 %v62_v7 }
  0x1c   :  { %138 = vmatpush.msra.mxu1 %v123_v22 }
  0x1d   :  { %82 = vmatpush.msra.mxu0 %v61_v8 }
  0x1e   :  { %139 = vmatpush.msra.mxu1 %v122_v23 }
  0x1f   :  { %83 = vmatpush.msra.mxu0 %v60_v9 }
  0x20   :  { %140 = vmatpush.msra.mxu1 %v121_v24 }
  0x21   :  { %84 = vmatpush.msra.mxu0 %v59_v10 }
  0x22   :  { %141 = vmatpush.msra.mxu1 %v120_v25 }
  0x23   :  { %85 = vmatpush.msra.mxu0 %v58_v11 }
  0x24   :  { %142 = vmatpush.msra.mxu1 %v119_v26 }
  0x25   :  { %86 = vmatpush.msra.mxu0 %v57_v12 }
  0x26   :  { %143 = vmatpush.msra.mxu1 %v118_v27 }
  0x27   :  { %87 = vmatpush.msra.mxu0 %v56_v13 }
  0x28   :  { %144 = vmatpush.msra.mxu1 %v117_v28 }
  0x29   :  { %88 = vmatpush.msra.mxu0 %v55_v14 }
  0x2a   :  { %145 = vmatpush.msra.mxu1 %v116_v29 }
  0x2b   :  { %89 = vmatpush.msra.mxu0 %v54_v15 }
  0x2c   :  { %90 = vmatmul.f32.vlgmr.msra.gmra.mxu0 %v53_v16  ;;  %146 = vmatpush.msra.mxu1 %v115_v30 }
  0x2e   :  { %147 = vmatpush.msra.mxu1 %v114_v31 }
  0x30   :  { %148 = vmatpush.msra.mxu1 %v113_v33 }
  0xa9   :  { %v91_v34 = vpop.f32.mrf.mxu0 }
  0xaa   :  { %v92_v35 = vadd.f32 %v199_v32, %v91_v34 }
  0xac   :  { %v94_v36 = vsub.f32 0.0, %v92_v35 }
  0xae   :  { %v95_v37 = vmul.f32 1.442695, %v94_v36 }
  0xb0   :  { %201 = vpow2.f32 %v95_v37 }
  0xb6   :  { %v202_v38 = vpop.eup %201 }
  0xb7   :  { %v97_v39 = vadd.f32 1.0, %v202_v38 }
  0xb9   :  { %203 = vrcp.f32 %v97_v39  ;;  %v109_v43 = vand.u32 2147483648, %v97_v39  ;;  %v107_v45 = vand.u32 2147483647, %v97_v39  ;;  %vm103_vm1 = vweird.f32 %v97_v39 }
  0xbb   :  { %v110_v47 = vor.u32 1.1754944e-38, %v109_v43  ;;  %vm108_vm3 = vcmp.eq.f32.partialorder %v107_v45, 8.507059e+37 }
  0xbf   :  { %v204_v40 = vpop.eup %203 }
  0xc0   :  { %v99_v41 = vmul.f32 %v204_v40, %v97_v39  ;;  %vm104_vm0 = vweird.f32 %v204_v40 }
  0xc1   :  { %vm105_vm2 = vmor %vm103_vm1, %vm104_vm0 }
  0xc2   :  { %v100_v42 = vsub.f32 1.0, %v99_v41 }
  0xc4   :  { %v101_v44 = vmul.f32 %v204_v40, %v100_v42 }
  0xc6   :  { %v102_v46 = vadd.f32 %v204_v40, %v101_v44 }
  0xc8   :  { %v106_v48 = vsel %vm105_vm2, %v204_v40, %v102_v46 }
  0xc9   :  { %v111_v49 = vsel %vm108_vm3, %v110_v47, %v106_v48 }
  0xca   :  { %149 = vmatmul.f32.vlgmr.msra.gmra.mxu1 %v111_v49 }
 0x147   :  { %v150_v51 = vpop.f32.mrf.mxu1 }
 0x148   :  { %v151_v52 = vadd.f32 %v200_v50, %v150_v51 }
 0x14a   :  { %153 = vmax.xlane.f32.xlu0 %v151_v52 }
 0x1bd   :  { %v154_v53 = vpop.xlane.xlu0 %153 }
 0x1be   :  { %v155_v54 = vsub.f32 %v151_v52, %v154_v53 }
 0x1c0   :  { %v156_v55 = vmul.f32 1.442695, %v155_v54 }
 0x1c2   :  { %205 = vpow2.f32 %v156_v55 }
 0x1c8   :  { %v206_v56 = vpop.eup %205 }
 0x1c9   :  { %158 = vadd.xlane.f32.xlu0 %v206_v56 }
 0x23c   :  { %v159_v57 = vpop.xlane.xlu0 %158 }
 0x23d   :  { %207 = vrcp.f32 %v159_v57  ;;  %v171_v61 = vand.u32 2147483648, %v159_v57  ;;  %v169_v63 = vand.u32 2147483647, %v159_v57  ;;  %vm165_vm5 = vweird.f32 %v159_v57 }
 0x23f   :  { %v172_v1 = vor.u32 1.1754944e-38, %v171_v61  ;;  %vm170_vm7 = vcmp.eq.f32.partialorder %v169_v63, 8.507059e+37 }
 0x243   :  { %v208_v58 = vpop.eup %207 }
 0x244   :  { %v161_v59 = vmul.f32 %v208_v58, %v159_v57  ;;  %vm166_vm4 = vweird.f32 %v208_v58 }
 0x245   :  { %vm167_vm6 = vmor %vm165_vm5, %vm166_vm4 }
 0x246   :  { %v162_v60 = vsub.f32 1.0, %v161_v59 }
 0x248   :  { %v163_v62 = vmul.f32 %v208_v58, %v162_v60 }
 0x24a   :  { %v164_v0 = vadd.f32 %v208_v58, %v163_v62 }
 0x24c   :  { %v168_v2 = vsel %vm167_vm6, %v208_v58, %v164_v0 }
 0x24d   :  { %v173_v3 = vsel %vm170_vm7, %v172_v1, %v168_v2 }
 0x24e   :  { %v174_v4 = vmul.f32 %v206_v56, %v173_v3 }
 0x250   :  { %175 = vst [vmem:[#allocation7] sm:$0xff] %v174_v4 }
 0x251   :  { %186 = dma.vmem_to_hbm [thread:$0]  %s182_s7, 128, %s184_s10, [#allocation4]  }
 0x252   :  { %285 = dma.done.wait [#allocation4], 128  }
 0x253   :  { %286 = vsyncadd [#allocation4], 4294967168 }
 0x254   :  { %191 = vsyncpa [#allocation3], 1 }
 0x255   :  { %192 = vsyncpa [#allocation6], 1 }
 0x256   :  { %193 = vsyncpa [#allocation4], 1 }

</bundles_post_ra>
